<compile_context>
chip_gen: v7x
topology: tpu7x:2x2x1
jax: 0.10.0
libtpu: 0.0.40
codegen_flags: <defaults>
</compile_context>

<pallas_src>
import functools

import jax
import jax.numpy as jnp
from jax.experimental import pallas as pl
from jax.experimental.pallas import tpu as pltpu


def _round_up(x, m):
    return ((x + m - 1) // m) * m


def _vmem_capacity_bytes():
    # Trace-time hardware query; conservative (v7x per-core) fallback if unavailable.
    try:
        cap = int(pltpu.get_tpu_info().vmem_capacity_bytes)
        if cap > 0:
            return cap
    except Exception:
        pass
    return 64 * 1024 * 1024


def _bert_output_kernel(x_ref, w_ref, p_ref, res_ref, o_ref, *, eps, n_chunks, mxu_dtype):
    # packed params: row 0 = dense bias, row 1 = LN gamma, row 2 = LN beta
    params = p_ref[...].astype(jnp.float32)            # (3, H)
    bias = params[0:1, :]
    gamma = params[1:2, :]
    beta = params[2:3, :]

    w = w_ref[...]
    if mxu_dtype is not None and w.dtype != jnp.dtype(mxu_dtype):
        w = w.astype(mxu_dtype)                        # normally already cast in wrapper

    tm = x_ref.shape[0]
    sub = tm // n_chunks

    def body(c, carry):
        r0 = pl.multiple_of(c * sub, sub)
        x = x_ref[pl.ds(r0, sub), :]
        if mxu_dtype is not None and x.dtype != jnp.dtype(mxu_dtype):
            x = x.astype(mxu_dtype)
        # dense: (sub, I) @ (I, H) on the MXU, f32 accumulation
        h = jnp.dot(x, w, preferred_element_type=jnp.float32)
        # bias + residual (dropout is identity in eval mode)
        # TODO(synk): training-mode dropout (hidden_dropout_prob) not implemented; eval only.
        h = h + bias + res_ref[pl.ds(r0, sub), :].astype(jnp.float32)
        # LayerNorm over the hidden (last) axis, all statistics in f32
        mean = jnp.mean(h, axis=-1, keepdims=True)
        cen = h - mean
        var = jnp.mean(cen * cen, axis=-1, keepdims=True)
        out = cen * jax.lax.rsqrt(var + eps) * gamma + beta
        o_ref[pl.ds(r0, sub), :] = out.astype(o_ref.dtype)
        return carry

    # Unrolled so the LLO scheduler can overlap chunk j's LN epilogue with chunk j+1's MXU.
    jax.lax.fori_loop(0, n_chunks, body, None, unroll=True)


def bert_output(hidden_states, input_tensor, w, b, gamma, beta, *,
                eps=1e-12, tm=None, mxu_dtype=None):
    """Fused BertOutput forward.

    hidden_states: (B, S, I)  intermediate activations
    input_tensor:  (B, S, H)  residual input
    w:             (I, H)     dense weight (transposed vs. nn.Linear's (H, I) storage)
    b, gamma, beta:(H,)       dense bias, LayerNorm weight, LayerNorm bias
    mxu_dtype:     optional dtype (e.g. jnp.bfloat16) for the matmul operands; the matmul
                   still accumulates in f32 and LayerNorm math stays f32.  Recommended for
                   f32 inputs on v5e.
    Returns (B, S, H) in hidden_states.dtype.
    """
    B, S, I = hidden_states.shape
    H = input_tensor.shape[-1]
    T = B * S

    if mxu_dtype is not None:
        mxu_dtype = jnp.dtype(mxu_dtype)
        if w.dtype != mxu_dtype:
            # Cast the resident weight once in the wrapper: halves its HBM read + VMEM use.
            w = w.astype(mxu_dtype)

    vmem_cap = _vmem_capacity_bytes()

    # Row tile: big enough to amortize the ~0.35us per-grid-step overhead (1024 on the
    # 128 MiB-VMEM chips, 512 otherwise), kept a multiple of 16 so f32/bf16 tiles stay
    # sublane-aligned, clamped to the token count.
    if tm is None:
        tm = 1024 if vmem_cap >= (96 << 20) else 512
    tm = _round_up(max(int(tm), 16), 16)
    tm = min(tm, _round_up(T, 16))
    if T > 64:
        # Guarantee >= 4 grid steps so ("parallel",) can shard across v7x's 2 TensorCores.
        tm = min(tm, _round_up(-(-T // 4), 16))
    tm = max(tm, 16)

    x_item = jnp.dtype(hidden_states.dtype).itemsize
    w_item = jnp.dtype(w.dtype).itemsize
    r_item = jnp.dtype(input_tensor.dtype).itemsize

    def footprint(rows):
        return (2 * rows * I * x_item            # streamed x tile, double-buffered
                + 1 * I * H * w_item             # resident weight, single-buffered
                + 8 * max(H, 128) * 4            # packed params block (tile-padded)
                + 2 * rows * H * r_item          # streamed residual tile
                + 2 * rows * H * x_item)         # streamed output tile

    # Leave ~25% headroom for compiler-internal scratch / semaphores.
    budget = (vmem_cap * 3) // 4
    while tm > 16 and footprint(tm) > budget:
        tm = max(16, _round_up(tm // 2, 16))

    # Sub-chunks inside each grid step (MXU / LN-epilogue overlap).
    n_chunks = 4 if tm % 64 == 0 else (2 if tm % 32 == 0 else 1)

    x2 = hidden_states.reshape(T, I)
    r2 = input_tensor.reshape(T, H)
    # Pack bias / gamma / beta into one small (3, H) f32 block with a constant index_map.
    params = jnp.stack([b, gamma, beta]).astype(jnp.float32)

    grid = -(-T // tm)
    vmem_limit = int(min(vmem_cap, max(footprint(tm) + (8 << 20), 32 << 20)))

    cost = pl.CostEstimate(
        flops=2 * T * I * H + 8 * T * H,
        transcendentals=T,  # one rsqrt per row
        bytes_accessed=(T * I * x_item + I * H * w_item + 3 * H * 4
                        + T * H * r_item + T * H * x_item))

    kernel = functools.partial(_bert_output_kernel, eps=eps,
                               n_chunks=n_chunks, mxu_dtype=mxu_dtype)

    out2 = pl.pallas_call(
        kernel,
        out_shape=jax.ShapeDtypeStruct((T, H), hidden_states.dtype),
        grid_spec=pltpu.PrefetchScalarGridSpec(
            num_scalar_prefetch=0,
            grid=(grid,),
            in_specs=[
                # streamed activation tile (ragged last block handled by Pallas)
                pl.BlockSpec((tm, I), lambda i: (i, 0)),
                # resident dense weight: constant index_map -> single-buffered
                pl.BlockSpec((I, H), lambda i: (0, 0), pipeline_mode=pl.Buffered(1)),
                # packed bias / gamma / beta: constant index_map -> single-buffered
                pl.BlockSpec((3, H), lambda i: (0, 0), pipeline_mode=pl.Buffered(1)),
                # streamed residual tile
                pl.BlockSpec((tm, H), lambda i: (i, 0)),
            ],
            out_specs=pl.BlockSpec((tm, H), lambda i: (i, 0)),
        ),
        compiler_params=pltpu.CompilerParams(
            # Token tiles are independent -> megacore-shardable across v7x's 2 TCs.
            dimension_semantics=("parallel",),
            vmem_limit_bytes=vmem_limit),
        cost_estimate=cost,
    )(x2, w, params, r2)

    return out2.reshape(B, S, H)


if __name__ == "__main__":
    # config: intermediate_size=512, hidden_size=128, layer_norm_eps=1e-12
    B, S, I, H = 2, 8, 512, 128
    key = jax.random.PRNGKey(0)
    k1, k2, k3, k4, k5, k6 = jax.random.split(key, 6)

    hidden_states = jax.random.normal(k1, (B, S, I), dtype=jnp.float32)
    input_tensor = jax.random.normal(k2, (B, S, H), dtype=jnp.float32)
    # deterministic synthetic parameters (nn.Linear weight (H, I) stored transposed as (I, H))
    w = jax.random.normal(k3, (I, H), dtype=jnp.float32) * 0.02
    b = jax.random.normal(k4, (H,), dtype=jnp.float32) * 0.02
    gamma = jnp.ones((H,), dtype=jnp.float32) + 0.01 * jax.random.normal(k5, (H,), dtype=jnp.float32)
    beta = 0.01 * jax.random.normal(k6, (H,), dtype=jnp.float32)

    def reference(hs, it):
        h = hs.reshape(-1, I).astype(jnp.float32) @ w + b
        h = h + it.reshape(-1, H).astype(jnp.float32)
        mu = h.mean(-1, keepdims=True)
        var = ((h - mu) ** 2).mean(-1, keepdims=True)
        r = ((h - mu) * jax.lax.rsqrt(var + 1e-12)) * gamma + beta
        return r.reshape(it.shape)

    # ---- f32 path ----
    out = bert_output(hidden_states, input_tensor, w, b, gamma, beta, eps=1e-12)
    jax.block_until_ready(out)
    ref = reference(hidden_states, input_tensor)
    assert out.shape == (B, S, H)
    assert jnp.allclose(out, ref, atol=1e-4, rtol=1e-4), "f32 mismatch vs reference"

    # ---- bf16 I/O path (halves HBM traffic on a bandwidth-bound op; LN math stays f32) ----
    out_bf16 = bert_output(hidden_states.astype(jnp.bfloat16),
                           input_tensor.astype(jnp.bfloat16),
                           w.astype(jnp.bfloat16), b, gamma, beta, eps=1e-12)
    jax.block_until_ready(out_bf16)
    assert out_bf16.dtype == jnp.bfloat16
    assert jnp.allclose(out_bf16.astype(jnp.float32), ref, atol=1e-1, rtol=1e-1), \
        "bf16 mismatch vs reference"

    # ---- f32 inputs with bf16 MXU operands (recommended on v5e; f32 accumulation + f32 LN) ----
    out_mxu = bert_output(hidden_states, input_tensor, w, b, gamma, beta,
                          eps=1e-12, mxu_dtype=jnp.bfloat16)
    jax.block_until_ready(out_mxu)
    assert jnp.allclose(out_mxu, ref, atol=1e-1, rtol=1e-1), "bf16-MXU mismatch vs reference"

    # ---- ragged token count, single step (T=15, not a multiple of the tile) ----
    B2, S2 = 3, 5
    hs2 = jax.random.normal(k1, (B2, S2, I), dtype=jnp.float32)
    it2 = jax.random.normal(k2, (B2, S2, H), dtype=jnp.float32)
    out2 = bert_output(hs2, it2, w, b, gamma, beta, eps=1e-12)
    jax.block_until_ready(out2)
    assert out2.shape == (B2, S2, H)
    assert jnp.allclose(out2, reference(hs2, it2), atol=1e-4, rtol=1e-4), \
        "ragged-T mismatch vs reference"

    # ---- ragged token count across a multi-step grid (T=100 -> 4 steps, masked tail writes) ----
    B3, S3 = 4, 25
    hs3 = jax.random.normal(k3, (B3, S3, I), dtype=jnp.float32)
    it3 = jax.random.normal(k4, (B3, S3, H), dtype=jnp.float32)
    out3 = bert_output(hs3, it3, w, b, gamma, beta, eps=1e-12)
    jax.block_until_ready(out3)
    assert out3.shape == (B3, S3, H)
    assert jnp.allclose(out3, reference(hs3, it3), atol=1e-4, rtol=1e-4), \
        "multi-step ragged-T mismatch vs reference"

    print("KERNEL_OK")
</pallas_src>

<mosaic_0001>
module attributes {stable_mosaic.version = 11 : i64} {
  func.func @_bert_output_kernel(%arg0: i32, %arg1: memref<16x512xf32, #tpu.memory_space<vmem>>, %arg2: memref<512x128xf32, #tpu.memory_space<vmem>>, %arg3: memref<3x128xf32, #tpu.memory_space<vmem>>, %arg4: memref<16x128xf32, #tpu.memory_space<vmem>>, %arg5: memref<16x128xf32, #tpu.memory_space<vmem>>) attributes {dimension_semantics = [#tpu.dimension_semantics<parallel>], iteration_bounds = array<i64: 1>, scalar_prefetch = 0 : i64, scratch_operands = 0 : i64, tpu.core_type = #tpu.core_type<tc>, window_params = [{transform_indices = @transform_0, window_bounds = array<i64: 16, 512>}, {pipeline_mode = #tpu.pipeline_mode<synchronous>, transform_indices = @transform_1, window_bounds = array<i64: 512, 128>}, {pipeline_mode = #tpu.pipeline_mode<synchronous>, transform_indices = @transform_2, window_bounds = array<i64: 3, 128>}, {transform_indices = @transform_3, window_bounds = array<i64: 16, 128>}, {transform_indices = @transform_4, window_bounds = array<i64: 16, 128>}]} {
    %c0 = arith.constant 0 : index
    %c0_0 = arith.constant 0 : index
    %0 = vector.load %arg3[%c0, %c0_0] : memref<3x128xf32, #tpu.memory_space<vmem>>, vector<3x128xf32>
    %1 = vector.extract_strided_slice %0 {offsets = [0, 0], sizes = [1, 128], strides = [1, 1]} : vector<3x128xf32> to vector<1x128xf32>
    %2 = vector.extract_strided_slice %0 {offsets = [1, 0], sizes = [1, 128], strides = [1, 1]} : vector<3x128xf32> to vector<1x128xf32>
    %3 = vector.extract_strided_slice %0 {offsets = [2, 0], sizes = [1, 128], strides = [1, 1]} : vector<3x128xf32> to vector<1x128xf32>
    %c0_1 = arith.constant 0 : index
    %c0_2 = arith.constant 0 : index
    %4 = vector.load %arg2[%c0_1, %c0_2] : memref<512x128xf32, #tpu.memory_space<vmem>>, vector<512x128xf32>
    %c0_i32 = arith.constant 0 : i32
    %c16_i32 = arith.constant 16 : i32
    %5 = arith.muli %c0_i32, %c16_i32 : i32
    %6 = tpu.assume_multiple %5, 16 : i32
    %7 = arith.index_cast %6 : i32 to index
    %c0_3 = arith.constant 0 : index
    %8 = vector.load %arg1[%7, %c0_3] : memref<16x512xf32, #tpu.memory_space<vmem>>, vector<16x512xf32>
    %cst = arith.constant dense<0.000000e+00> : vector<16x128xf32>
    %9 = tpu.matmul %8, %4, %cst {dimension_numbers = #tpu.dot_dimension_numbers<[1], [0], [0], [1], [0, 0, 1, 1], [], []>} : vector<16x512xf32>, vector<512x128xf32>, vector<16x128xf32> -> vector<16x128xf32>
    %10 = vector.broadcast %1 : vector<1x128xf32> to vector<16x128xf32>
    %11 = arith.addf %9, %10 : vector<16x128xf32>
    %12 = arith.index_cast %6 : i32 to index
    %c0_4 = arith.constant 0 : index
    %13 = vector.load %arg4[%12, %c0_4] : memref<16x128xf32, #tpu.memory_space<vmem>>, vector<16x128xf32>
    %14 = arith.addf %11, %13 : vector<16x128xf32>
    %cst_5 = arith.constant dense<0.000000e+00> : vector<16xf32>
    %15 = vector.multi_reduction <add>, %14, %cst_5 [1] : vector<16x128xf32> to vector<16xf32>
    %16 = vector.shape_cast %15 : vector<16xf32> to vector<16x1xf32>
    %cst_6 = arith.constant 1.280000e+02 : f32
    %17 = vector.broadcast %cst_6 : f32 to vector<16x1xf32>
    %18 = arith.divf %16, %17 : vector<16x1xf32>
    %19 = vector.broadcast %18 : vector<16x1xf32> to vector<16x128xf32>
    %20 = arith.subf %14, %19 : vector<16x128xf32>
    %21 = arith.mulf %20, %20 : vector<16x128xf32>
    %cst_7 = arith.constant dense<0.000000e+00> : vector<16xf32>
    %22 = vector.multi_reduction <add>, %21, %cst_7 [1] : vector<16x128xf32> to vector<16xf32>
    %23 = vector.shape_cast %22 : vector<16xf32> to vector<16x1xf32>
    %cst_8 = arith.constant 1.280000e+02 : f32
    %24 = vector.broadcast %cst_8 : f32 to vector<16x1xf32>
    %25 = arith.divf %23, %24 : vector<16x1xf32>
    %cst_9 = arith.constant 9.99999996E-13 : f32
    %26 = vector.broadcast %cst_9 : f32 to vector<16x1xf32>
    %27 = arith.addf %25, %26 : vector<16x1xf32>
    %28 = math.rsqrt %27 : vector<16x1xf32>
    %29 = vector.broadcast %28 : vector<16x1xf32> to vector<16x128xf32>
    %30 = arith.mulf %20, %29 : vector<16x128xf32>
    %31 = vector.broadcast %2 : vector<1x128xf32> to vector<16x128xf32>
    %32 = arith.mulf %30, %31 : vector<16x128xf32>
    %33 = vector.broadcast %3 : vector<1x128xf32> to vector<16x128xf32>
    %34 = arith.addf %32, %33 : vector<16x128xf32>
    %35 = arith.index_cast %6 : i32 to index
    %c0_10 = arith.constant 0 : index
    %36 = vector.load %arg5[%35, %c0_10] : memref<16x128xf32, #tpu.memory_space<vmem>>, vector<16x128xf32>
    tpu.vector_store %arg5[%35, %c0_10], %34 {strides = array<i32>} : memref<16x128xf32, #tpu.memory_space<vmem>>, vector<16x128xf32>,
    %c1_i32 = arith.constant 1 : i32
    return
  }
  func.func @transform_0(%arg0: i32) -> (i32, i32) {
    %c0_i32 = arith.constant 0 : i32
    %c0_i32_0 = arith.constant 0 : i32
    return %arg0, %c0_i32 : i32, i32
  }
  func.func @transform_1(%arg0: i32) -> (i32, i32) {
    %c0_i32 = arith.constant 0 : i32
    %c0_i32_0 = arith.constant 0 : i32
    %c0_i32_1 = arith.constant 0 : i32
    return %c0_i32, %c0_i32_0 : i32, i32
  }
  func.func @transform_2(%arg0: i32) -> (i32, i32) {
    %c0_i32 = arith.constant 0 : i32
    %c0_i32_0 = arith.constant 0 : i32
    %c0_i32_1 = arith.constant 0 : i32
    return %c0_i32, %c0_i32_0 : i32, i32
  }
  func.func @transform_3(%arg0: i32) -> (i32, i32) {
    %c0_i32 = arith.constant 0 : i32
    %c0_i32_0 = arith.constant 0 : i32
    return %arg0, %c0_i32 : i32, i32
  }
  func.func @transform_4(%arg0: i32) -> (i32, i32) {
    %c0_i32 = arith.constant 0 : i32
    %c0_i32_0 = arith.constant 0 : i32
    return %arg0, %c0_i32 : i32, i32
  }
}

</mosaic_0001>

<bundles_post_ra>
// kernel: tpu_custom_call.1
= control target key start
LH: loop header
LB: loop body
LE: loop exit
PB: predicated region body
PF: predicated region fallthrough
CT: control target
= control target key end

     0   :  { %9 = vsyncpa [#allocation3], 0  ;;  %s687_s0 = inlined_call_operand.hbm [shape: f32[16,512], index: 0, kind: input, shape index: {}]   ;;  %s688_s1 = inlined_call_operand.hbm [shape: f32[512,128], index: 1, kind: input, shape index: {}]   ;;  %s689_s2 = inlined_call_operand.vmem [shape: f32[3,128], index: 2, kind: input, shape index: {}]   ;;  %s690_s3 = inlined_call_operand.hbm [shape: f32[16,128], index: 3, kind: input, shape index: {}]   ;;  %s691_s4 = inlined_call_operand.hbm [shape: f32[16,128], index: 4, kind: output, shape index: {}]  }
   0x1   :  { %10 = vsyncpa [#allocation6], 0 }
   0x2   :  { %11 = vsyncpa [#allocation4], 0  ;;  %s594_s15 = smov [#allocation5]   ;;  %s500_s19 = scalar_lea.hbm %s688_s1, 8192 }
   0x3   :  { %s29_s16 = sshll.u32 %s594_s15, 4  ;;  %p501_p0 = scmp.ne.s32.totalorder %s688_s1, %s500_s19  ;;  %s30_s16 = int_to_ptr.vmem [resolvable:$true] %s29_s16 }
   0x4   :  { %p504_p1 = scmp.lt.u32.totalorder %s500_s19, %s688_s1 }
   0x6   :  { %p506_p2 = pnand %p504_p1, %p501_p0 }
   0x8   :  { %509 = shalt.err (!%p506_p2)
}
   0x9   :  { %s510_s24 = scalar_lea.vmem %s30_s16, 8192  ;;  %p515_p4 = scmp.lt.s32.totalorder %s30_s16, %s30_s16 }
   0xa   :  { %p511_p3 = scmp.ne.s32.totalorder %s30_s16, %s510_s24  ;;  %p516_p5 = scmp.lt.s32.totalorder %s510_s24, %s510_s24 }
   0xc   :  { %p517_p6 = por %p516_p5, %p515_p4 }
   0xe   :  { %p518_p7 = pnand %p517_p6, %p511_p3 }
  0x10   :  { %521 = shalt.err (!%p518_p7)
}
  0x11   :  { %s595_s25 = smov 128   ;;  %s596_s26 = smov 8  }
  0x12   :  { %35 = dma.hbm_to_vmem [thread:$0]  %s688_s1, 8192, %s30_s16, [#allocation6], %s595_s25, %s595_s25, %s596_s26  }
  0x13   :  { %s597_s29 = smov [#allocation2]   ;;  %s522_s7 = scalar_lea.hbm %s687_s0, 1024 }
  0x14   :  { %s17_s30 = sshll.u32 %s597_s29, 4  ;;  %p523_p8 = scmp.ne.s32.totalorder %s687_s0, %s522_s7  ;;  %s18_s30 = int_to_ptr.vmem [resolvable:$true] %s17_s30 }
  0x15   :  { %p526_p9 = scmp.lt.u32.totalorder %s522_s7, %s687_s0 }
  0x17   :  { %p528_p10 = pnand %p526_p9, %p523_p8 }
  0x19   :  { %531 = shalt.err (!%p528_p10)
}
  0x1a   :  { %s532_s12 = scalar_lea.vmem %s18_s30, 1024  ;;  %p537_p12 = scmp.lt.s32.totalorder %s18_s30, %s18_s30 }
  0x1b   :  { %p533_p11 = scmp.ne.s32.totalorder %s18_s30, %s532_s12  ;;  %p538_p13 = scmp.lt.s32.totalorder %s532_s12, %s532_s12 }
  0x1d   :  { %p539_p0 = por %p538_p13, %p537_p12 }
  0x1f   :  { %p540_p1 = pnand %p539_p0, %p533_p11 }
  0x21   :  { %543 = shalt.err (!%p540_p1)
}
  0x22   :  { %s598_s1 = smov 512   ;;  %s599_s13 = smov 32  }
  0x23   :  { %23 = dma.hbm_to_vmem [thread:$0]  %s687_s0, 1024, %s18_s30, [#allocation3], %s598_s1, %s598_s1, %s599_s13  }
  0x24   :  { %s600_s16 = smov [#allocation7]   ;;  %s544_s20 = scalar_lea.hbm %s690_s3, 256 }
  0x25   :  { %s43_s17 = sshll.u32 %s600_s16, 4  ;;  %p545_p2 = scmp.ne.s32.totalorder %s690_s3, %s544_s20  ;;  %s44_s17 = int_to_ptr.vmem [resolvable:$true] %s43_s17 }
  0x26   :  { %p548_p3 = scmp.lt.u32.totalorder %s544_s20, %s690_s3 }
  0x28   :  { %p550_p4 = pnand %p548_p3, %p545_p2 }
  0x2a   :  { %553 = shalt.err (!%p550_p4)
}
  0x2b   :  { %s554_s27 = scalar_lea.vmem %s44_s17, 256  ;;  %p559_p6 = scmp.lt.s32.totalorder %s44_s17, %s44_s17 }
  0x2c   :  { %p555_p5 = scmp.ne.s32.totalorder %s44_s17, %s554_s27  ;;  %p560_p7 = scmp.lt.s32.totalorder %s554_s27, %s554_s27 }
  0x2e   :  { %p561_p8 = por %p560_p7, %p559_p6 }
  0x30   :  { %p562_p9 = pnand %p561_p8, %p555_p5 }
  0x32   :  { %565 = shalt.err (!%p562_p9)
}
  0x33   :  { %49 = dma.hbm_to_vmem [thread:$0]  %s690_s3, 256, %s44_s17, [#allocation6], %s595_s25, %s595_s25, %s596_s26  }
  0x34   :  { %588 = dma.done.wait [#allocation3], 1024  }
  0x35   :  { %589 = vsyncadd [#allocation3], 4294966272 }
  0x36   :  { %590 = dma.done.wait [#allocation6], 8448  }
  0x37   :  { %591 = vsyncadd [#allocation6], 4294958848  ;;  %v76_v0 = vld [vmem:[#allocation5 + $0x80] sm:$0xff]  ;;  %v77_v1 = vld [vmem:[#allocation5 + $0x88] sm:$0xff] }
  0x38   :  { %v60_v2 = vld [vmem:[#allocation5] sm:$0xff]  ;;  %v424_v3 = vpack.c.bf16 %v77_v1, %v76_v0  ;;  %v61_v4 = vld [vmem:[#allocation5 + $0x8] sm:$0xff]  ;;  %v78_v11 = vld [vmem:[#allocation5 + $0x90] sm:$0xff] }
  0x39   :  { %v108_v5 = vld [vmem:[#allocation5 + $0x180] sm:$0xff]  ;;  %v109_v6 = vld [vmem:[#allocation5 + $0x188] sm:$0xff]  ;;  %v426_v7 = vpack.c.bf16 %v61_v4, %v60_v2  ;;  %v79_v13 = vld [vmem:[#allocation5 + $0x98] sm:$0xff] }
  0x3a   :  { %v456_v8 = vpack.c.bf16 %v109_v6, %v108_v5  ;;  %v92_v9 = vld [vmem:[#allocation5 + $0x100] sm:$0xff]  ;;  %v93_v10 = vld [vmem:[#allocation5 + $0x108] sm:$0xff]  ;;  %425 = vmatprep.subr.bf16.mxu0 %v424_v3  ;;  %v62_v14 = vld [vmem:[#allocation5 + $0x10] sm:$0xff]  ;;  %v428_v16 = vpack.c.bf16 %v79_v13, %v78_v11 }
  0x3b   :  { %v458_v12 = vpack.c.bf16 %v93_v10, %v92_v9  ;;  %v63_v15 = vld [vmem:[#allocation5 + $0x18] sm:$0xff]  ;;  %427 = vmatpush3.bf16.msra.mxu0 %v426_v7  ;;  %v110_v18 = vld [vmem:[#allocation5 + $0x190] sm:$0xff]  ;;  %v80_v23 = vld [vmem:[#allocation5 + $0xa0] sm:$0xff] }
  0x3c   :  { %457 = vmatprep.subr.bf16.mxu1 %v456_v8  ;;  %v430_v17 = vpack.c.bf16 %v63_v15, %v62_v14  ;;  %v111_v19 = vld [vmem:[#allocation5 + $0x198] sm:$0xff]  ;;  %v94_v20 = vld [vmem:[#allocation5 + $0x110] sm:$0xff]  ;;  %v81_v24 = vld [vmem:[#allocation5 + $0xa8] sm:$0xff]  ;;  %429 = vmatprep.subr.bf16.mxu0 %v428_v16 }
  0x3d   :  { %459 = vmatpush3.bf16.msra.mxu1 %v458_v12  ;;  %v460_v21 = vpack.c.bf16 %v111_v19, %v110_v18  ;;  %v95_v22 = vld [vmem:[#allocation5 + $0x118] sm:$0xff]  ;;  %v432_v26 = vpack.c.bf16 %v81_v24, %v80_v23  ;;  %v64_v27 = vld [vmem:[#allocation5 + $0x20] sm:$0xff]  ;;  %v65_v28 = vld [vmem:[#allocation5 + $0x28] sm:$0xff] }
  0x3e   :  { %v462_v25 = vpack.c.bf16 %v95_v22, %v94_v20  ;;  %v112_v29 = vld [vmem:[#allocation5 + $0x1a0] sm:$0xff]  ;;  %v113_v30 = vld [vmem:[#allocation5 + $0x1a8] sm:$0xff]  ;;  %v434_v33 = vpack.c.bf16 %v65_v28, %v64_v27  ;;  %v82_v35 = vld [vmem:[#allocation5 + $0xb0] sm:$0xff] }
  0x3f   :  { %461 = vmatprep.subr.bf16.mxu1 %v460_v21  ;;  %v96_v31 = vld [vmem:[#allocation5 + $0x120] sm:$0xff]  ;;  %v97_v32 = vld [vmem:[#allocation5 + $0x128] sm:$0xff]  ;;  %431 = vmatpush3.bf16.msra.mxu0 %v430_v17  ;;  %v464_v34 = vpack.c.bf16 %v113_v30, %v112_v29  ;;  %v83_v36 = vld [vmem:[#allocation5 + $0xb8] sm:$0xff] }
  0x40   :  { %v66_v37 = vld [vmem:[#allocation5 + $0x30] sm:$0xff]  ;;  %433 = vmatprep.subr.bf16.mxu0 %v432_v26  ;;  %v466_v38 = vpack.c.bf16 %v97_v32, %v96_v31  ;;  %v436_v39 = vpack.c.bf16 %v83_v36, %v82_v35  ;;  %v67_v40 = vld [vmem:[#allocation5 + $0x38] sm:$0xff]  ;;  %v84_v46 = vld [vmem:[#allocation5 + $0xc0] sm:$0xff] }
  0x41   :  { %463 = vmatpush3.bf16.msra.mxu1 %v462_v25  ;;  %v114_v41 = vld [vmem:[#allocation5 + $0x1b0] sm:$0xff]  ;;  %v115_v42 = vld [vmem:[#allocation5 + $0x1b8] sm:$0xff]  ;;  %v85_v47 = vld [vmem:[#allocation5 + $0xc8] sm:$0xff]  ;;  %v438_v48 = vpack.c.bf16 %v67_v40, %v66_v37  ;;  %v135_v40 = vlaneseq }
  0x42   :  { %465 = vmatprep.subr.bf16.mxu1 %v464_v34  ;;  %v468_v43 = vpack.c.bf16 %v115_v42, %v114_v41  ;;  %v98_v44 = vld [vmem:[#allocation5 + $0x130] sm:$0xff]  ;;  %v99_v45 = vld [vmem:[#allocation5 + $0x138] sm:$0xff]  ;;  %v116_v49 = vld [vmem:[#allocation5 + $0x1c0] sm:$0xff]  ;;  %v440_v52 = vpack.c.bf16 %v85_v47, %v84_v46 }
  0x43   :  { %435 = vmatpush3.bf16.msra.mxu0 %v434_v33  ;;  %v117_v50 = vld [vmem:[#allocation5 + $0x1c8] sm:$0xff]  ;;  %v470_v51 = vpack.c.bf16 %v99_v45, %v98_v44  ;;  %v68_v53 = vld [vmem:[#allocation5 + $0x40] sm:$0xff]  ;;  %v86_v58 = vld [vmem:[#allocation5 + $0xd0] sm:$0xff]  ;;  %v136_v41 = vshrl.u32 %v135_v40, 7 }
  0x44   :  { %437 = vmatprep.subr.bf16.mxu0 %v436_v39  ;;  %v69_v54 = vld [vmem:[#allocation5 + $0x48] sm:$0xff]  ;;  %v100_v55 = vld [vmem:[#allocation5 + $0x140] sm:$0xff]  ;;  %v472_v56 = vpack.c.bf16 %v117_v50, %v116_v49  ;;  %v87_v59 = vld [vmem:[#allocation5 + $0xd8] sm:$0xff] }
  0x45   :  { %467 = vmatpush3.bf16.msra.mxu1 %v466_v38  ;;  %v101_v57 = vld [vmem:[#allocation5 + $0x148] sm:$0xff]  ;;  %v118_v60 = vld [vmem:[#allocation5 + $0x1d0] sm:$0xff]  ;;  %v119_v61 = vld [vmem:[#allocation5 + $0x1d8] sm:$0xff]  ;;  %v442_v62 = vpack.c.bf16 %v69_v54, %v68_v53  ;;  %v444_v0 = vpack.c.bf16 %v87_v59, %v86_v58  ;;  %v137_v42 = vsub.s32 0, %v136_v41 }
  0x46   :  { %469 = vmatprep.subr.bf16.mxu1 %v468_v43  ;;  %v474_v63 = vpack.c.bf16 %v101_v57, %v100_v55  ;;  %v70_v1 = vld [vmem:[#allocation5 + $0x50] sm:$0xff]  ;;  %v71_v2 = vld [vmem:[#allocation5 + $0x58] sm:$0xff]  ;;  %v476_v4 = vpack.c.bf16 %v119_v61, %v118_v60  ;;  %v88_v6 = vld [vmem:[#allocation5 + $0xe0] sm:$0xff] }
  0x47   :  { %439 = vmatpush3.bf16.msra.mxu0 %v438_v48  ;;  %v102_v3 = vld [vmem:[#allocation5 + $0x150] sm:$0xff]  ;;  %v103_v5 = vld [vmem:[#allocation5 + $0x158] sm:$0xff]  ;;  %v89_v7 = vld [vmem:[#allocation5 + $0xe8] sm:$0xff]  ;;  %v446_v10 = vpack.c.bf16 %v71_v2, %v70_v1 }
  0x48   :  { %441 = vmatprep.subr.bf16.mxu0 %v440_v52  ;;  %v120_v8 = vld [vmem:[#allocation5 + $0x1e0] sm:$0xff]  ;;  %v121_v9 = vld [vmem:[#allocation5 + $0x1e8] sm:$0xff]  ;;  %v478_v13 = vpack.c.bf16 %v103_v5, %v102_v3  ;;  %v448_v14 = vpack.c.bf16 %v89_v7, %v88_v6  ;;  %v90_v19 = vld [vmem:[#allocation5 + $0xf0] sm:$0xff] }
  0x49   :  { %471 = vmatpush3.bf16.msra.mxu1 %v470_v51  ;;  %v72_v11 = vld [vmem:[#allocation5 + $0x60] sm:$0xff]  ;;  %v73_v12 = vld [vmem:[#allocation5 + $0x68] sm:$0xff]  ;;  %v480_v18 = vpack.c.bf16 %v121_v9, %v120_v8  ;;  %v91_v20 = vld [vmem:[#allocation5 + $0xf8] sm:$0xff] }
  0x4a   :  { %473 = vmatprep.subr.bf16.mxu1 %v472_v56  ;;  %v104_v15 = vld [vmem:[#allocation5 + $0x160] sm:$0xff]  ;;  %v105_v16 = vld [vmem:[#allocation5 + $0x168] sm:$0xff]  ;;  %v130_v21 = vld [vmem:[#allocation2 + $0x18] sm:$0xff]  ;;  %v450_v24 = vpack.c.bf16 %v73_v12, %v72_v11  ;;  %v452_v26 = vpack.c.bf16 %v91_v20, %v90_v19 }
  0x4b   :  { %443 = vmatpush3.bf16.msra.mxu0 %v442_v62  ;;  %v128_v17 = vld [vmem:[#allocation2 + $0x8] sm:$0xff]  ;;  %v122_v22 = vld [vmem:[#allocation5 + $0x1f0] sm:$0xff]  ;;  %v123_v23 = vld [vmem:[#allocation5 + $0x1f8] sm:$0xff]  ;;  %278 = vmatprep.mubr.f32.mxu1 %v130_v21  ;;  %v482_v25 = vpack.c.bf16 %v105_v16, %v104_v15  ;;  %v318_v15 = vsub.s32 1, %v136_v41  ;;  %v324_v16 = vsub.s32 2, %v136_v41 }
  0x4c   :  { %445 = vmatprep.subr.bf16.mxu0 %v444_v0  ;;  %203 = vmatprep.mubr.f32.mxu0 %v128_v17  ;;  %v74_v27 = vld [vmem:[#allocation5 + $0x70] sm:$0xff]  ;;  %v75_v28 = vld [vmem:[#allocation5 + $0x78] sm:$0xff]  ;;  %v484_v29 = vpack.c.bf16 %v123_v23, %v122_v22  ;;  %v127_v34 = vld [vmem:[#allocation2] sm:$0xff] }
  0x4d   :  { %475 = vmatpush3.bf16.msra.mxu1 %v474_v63  ;;  %v106_v30 = vld [vmem:[#allocation5 + $0x170] sm:$0xff]  ;;  %v107_v31 = vld [vmem:[#allocation5 + $0x178] sm:$0xff]  ;;  %v454_v32 = vpack.c.bf16 %v75_v28, %v74_v27  ;;  %v132_v36 = vld [vmem:[#allocation2 + $0x28] sm:$0xff] }
  0x4e   :  { %477 = vmatprep.subr.bf16.mxu1 %v476_v4  ;;  %v486_v33 = vpack.c.bf16 %v107_v31, %v106_v30  ;;  %v129_v35 = vld [vmem:[#allocation2 + $0x10] sm:$0xff]  ;;  %v134_v37 = vld [vmem:[#allocation2 + $0x38] sm:$0xff]  ;;  %v131_v38 = vld [vmem:[#allocation2 + $0x20] sm:$0xff] }
  0x4f   :  { %447 = vmatpush3.bf16.msra.mxu0 %v446_v10  ;;  %v133_v39 = vld [vmem:[#allocation2 + $0x30] sm:$0xff]  ;;  %v59_v43 = vld [vmem:[%s689_s2] sm:$0x7]  ;;  %v290_v62 = vld [vmem:[#allocation7 + $0x8] sm:$0xff]  ;;  %s601_s2 = smov [#allocation8]  }
  0x50   :  { %449 = vmatprep.subr.bf16.mxu0 %v448_v14  ;;  %v138_v45 = vrot.slane %v59_v43, %v137_v42  ;;  %v289_v55 = vld [vmem:[#allocation7] sm:$0xff]  ;;  %v319_v17 = vrot.slane %v59_v43, %v318_v15  ;;  %v325_v20 = vrot.slane %v59_v43, %v324_v16  ;;  %s335_s30 = sshll.u32 %s601_s2, 4  ;;  %s336_s30 = int_to_ptr.vmem [resolvable:$true] %s335_s30 }
  0x51   :  { %479 = vmatpush3.bf16.msra.mxu1 %v478_v13  ;;  %s566_s5 = scalar_lea.vmem %s336_s30, 256  ;;  %p571_p11 = scmp.lt.s32.totalorder %s336_s30, %s336_s30 }
  0x52   :  { %481 = vmatprep.subr.bf16.mxu1 %v480_v18  ;;  %p567_p10 = scmp.ne.s32.totalorder %s336_s30, %s566_s5  ;;  %p572_p12 = scmp.lt.s32.totalorder %s566_s5, %s566_s5 }
  0x53   :  { %451 = vmatpush3.bf16.msra.mxu0 %v450_v24 }
  0x54   :  { %453 = vmatprep.subr.bf16.mxu0 %v452_v26  ;;  %p573_p13 = por %p572_p12, %p571_p11 }
  0x55   :  { %483 = vmatpush3.bf16.msra.mxu1 %v482_v25 }
  0x56   :  { %485 = vmatprep.subr.bf16.mxu1 %v484_v29  ;;  %p574_p0 = pnand %p573_p13, %p567_p10 }
  0x57   :  { %455 = vmatpush3.bf16.msra.mxu0 %v454_v32 }
  0x59   :  { %487 = vmatpush3.bf16.msra.mxu1 %v486_v33 }
  0x5a   :  { %204 = vmatmul.mubr.f32.vlgmr.msra.gmra.mrb[0].mxu0 %v127_v34 }
  0x5b   :  { %208 = vmatprep.mubr.f32.mxu0 %v132_v36 }
  0x5c   :  { %279 = vmatmul.mubr.f32.vlgmr.msra.gmra.mrb[0].mxu1 %v129_v35 }
  0x5d   :  { %283 = vmatprep.mubr.f32.mxu1 %v134_v37 }
  0x5e   :  { %209 = vmatmul.mubr.f32.gmra.mrb[2].mxu0 %v131_v38 }
  0x60   :  { %284 = vmatmul.mubr.f32.gmra.mrb[2].mxu1 %v133_v39 }
 0x12d   :  { %v380_v44 = vpop.f32.mrb[0].mxu0 }
 0x12e   :  { %v381_v46 = vpop.f32.mrb[1].mxu0 }
 0x12f   :  { %v418_v47 = vpop.f32.mrb[0].mxu1  ;;  %v382_v48 = vadd.f32 %v381_v46, %v380_v44 }
 0x130   :  { %v419_v49 = vpop.f32.mrb[1].mxu1 }
 0x131   :  { %v420_v50 = vadd.f32 %v419_v49, %v418_v47  ;;  %v206_v51 = vadd.f32 %v382_v48, %v138_v45  ;;  %v383_v52 = vpop.f32.mrb[2].mxu0 }
 0x132   :  { %v384_v53 = vpop.f32.mrb[3].mxu0 }
 0x133   :  { %v421_v54 = vpop.f32.mrb[2].mxu1  ;;  %v281_v56 = vadd.f32 %v420_v50, %v206_v51  ;;  %v385_v57 = vadd.f32 %v384_v53, %v383_v52 }
 0x134   :  { %v422_v58 = vpop.f32.mrb[3].mxu1 }
 0x135   :  { %v423_v59 = vadd.f32 %v422_v58, %v421_v54  ;;  %v211_v60 = vadd.f32 %v385_v57, %v138_v45  ;;  %v291_v61 = vadd.f32 %v289_v55, %v281_v56 }
 0x137   :  { %v286_v63 = vadd.f32 %v423_v59, %v211_v60  ;;  %293 = vadd.xlane.f32.xlu0 %v291_v61 }
 0x139   :  { %v292_v0 = vadd.f32 %v290_v62, %v286_v63 }
 0x13b   :  { %295 = vadd.xlane.f32.xlu0 %v292_v0 }
 0x1c4   :  { %v294_v1 = vpop.xlane.xlu0 %293 }
 0x1c5   :  { %v298_v2 = vmul.f32 0.0078125, %v294_v1 }
 0x1c7   :  { %v300_v3 = vsub.f32 %v291_v61, %v298_v2 }
 0x1c8   :  { %v296_v4 = vpop.xlane.xlu0 %295 }
 0x1c9   :  { %v299_v5 = vmul.f32 0.0078125, %v296_v4  ;;  %v302_v6 = vmul.f32 %v300_v3, %v300_v3 }
 0x1cb   :  { %v301_v7 = vsub.f32 %v292_v0, %v299_v5  ;;  %304 = vadd.xlane.f32.xlu1 %v302_v6 }
 0x1cd   :  { %v303_v8 = vmul.f32 %v301_v7, %v301_v7 }
 0x1cf   :  { %306 = vadd.xlane.f32.xlu1 %v303_v8 }
 0x258   :  { %v305_v9 = vpop.xlane.xlu1 %304 }
 0x259   :  { %v308_v10 = vmul.f32 0.0078125, %v305_v9 }
 0x25b   :  { %v310_v11 = vadd.f32 1e-12, %v308_v10 }
 0x25c   :  { %v307_v12 = vpop.xlane.xlu1 %306 }
 0x25d   :  { %496 = vrsqrt.f32 %v310_v11  ;;  %v309_v13 = vmul.f32 0.0078125, %v307_v12 }
 0x25f   :  { %v311_v14 = vadd.f32 1e-12, %v309_v13 }
 0x261   :  { %498 = vrsqrt.f32 %v311_v14 }
 0x267   :  { %v497_v18 = vpop.eup %496 }
 0x268   :  { %v314_v19 = vmul.f32 %v497_v18, %v300_v3 }
 0x26a   :  { %v320_v21 = vmul.f32 %v319_v17, %v314_v19 }
 0x26b   :  { %v499_v22 = vpop.eup %498 }
 0x26c   :  { %v315_v23 = vmul.f32 %v499_v22, %v301_v7  ;;  %v326_v24 = vadd.f32 %v325_v20, %v320_v21 }
 0x26e   :  { %v321_v25 = vmul.f32 %v319_v17, %v315_v23  ;;  %328 = vst [vmem:[#allocation8] sm:$0xff] %v326_v24 }
 0x270   :  { %v327_v26 = vadd.f32 %v325_v20, %v321_v25 }
 0x272   :  { %329 = vst [vmem:[#allocation8 + $0x8] sm:$0xff] %v327_v26 }
 0x273   :  { %577 = shalt.err (!%p574_p0)
}
 0x274   :  { %s578_s8 = scalar_lea.hbm %s691_s4, 256 }
 0x275   :  { %p579_p1 = scmp.ne.s32.totalorder %s691_s4, %s578_s8  ;;  %p582_p2 = scmp.lt.u32.totalorder %s578_s8, %s691_s4 }
 0x277   :  { %p584_p3 = pnand %p582_p2, %p579_p1 }
 0x279   :  { %587 = shalt.err (!%p584_p3)
}
 0x27a   :  { %341 = dma.vmem_to_hbm [thread:$0]  %s336_s30, 256, %s691_s4, [#allocation4], %s595_s25, %s595_s25, %s596_s26  }
 0x27b   :  { %592 = dma.done.wait [#allocation4], 256  }
 0x27c   :  { %593 = vsyncadd [#allocation4], 4294967040 }
 0x27d   :  { %345 = vsyncpa [#allocation3], 1 }
 0x27e   :  { %346 = vsyncpa [#allocation6], 1 }
 0x27f   :  { %347 = vsyncpa [#allocation4], 1 }

</bundles_post_ra>
